<compile_context>
chip_gen: v6e
topology: v6e:2x2x1
jax: 0.10.0
libtpu: 0.0.40
codegen_flags: <defaults>
</compile_context>

<pallas_src>
import functools

import jax
import jax.numpy as jnp
from jax.experimental import pallas as pl
from jax.experimental.pallas import tpu as pltpu

_LANES = 128
_TILE_ROWS = 2048          # rows of 128 lanes per grid step (1 MiB f32)


# ---------------------------------------------------------------------------
# One-time probe: rotation convention of pltpu.roll along the lane axis.
# We need nxt[i] == x[(i + 1) % 128]; that is shift=127 for jnp.roll-style
# semantics (result[i] = x[i - s]) or shift=1 for the inverse convention.
# ---------------------------------------------------------------------------
def _roll_probe_kernel(x_ref, o_ref):
    o_ref[...] = pltpu.roll(x_ref[...], 1, 1)


_ROLL_NEXT_SHIFT = None


def _roll_next_shift():
    global _ROLL_NEXT_SHIFT
    if _ROLL_NEXT_SHIFT is None:
        x = jnp.broadcast_to(jnp.arange(_LANES, dtype=jnp.float32),
                             (8, _LANES))
        r = pl.pallas_call(
            _roll_probe_kernel,
            out_shape=jax.ShapeDtypeStruct((8, _LANES), jnp.float32),
        )(x)
        # r[0,0] == 1   -> result[i] = x[i + shift]  -> use shift = 1
        # r[0,0] == 127 -> result[i] = x[i - shift]  -> use shift = 127 (== -1)
        _ROLL_NEXT_SHIFT = 1 if int(r[0, 0]) == 1 else _LANES - 1
    return _ROLL_NEXT_SHIFT


# ---------------------------------------------------------------------------
# Main kernel.
# ---------------------------------------------------------------------------
def _nme_kernel(o_ref, l_ref, out_ref, acc_ref, *,
                rows_total, tile_rows, inner_steps, shift_next):
    c = pl.program_id(0)        # TensorCore split (size 2, "parallel")
    i = pl.program_id(1)        # row-tile stream  ("arbitrary")

    @pl.when(i == 0)
    def _init():
        acc_ref[...] = jnp.zeros_like(acc_ref)

    d = o_ref[...].astype(jnp.float32) - l_ref[...].astype(jnp.float32)
    sq = d * d                                     # lane 2k: dx^2, 2k+1: dy^2
    pair = sq + pltpu.roll(sq, shift_next, 1)      # even lanes: dx^2 + dy^2

    # Unclamped global row index: masks partial / duplicated edge blocks and
    # keeps only the even (per-point) lanes.  Mask before sqrt so garbage in
    # out-of-range rows can never poison the sum.
    blk = c * inner_steps + i
    row = jax.lax.broadcasted_iota(jnp.int32, pair.shape, 0) + blk * tile_rows
    lane = jax.lax.broadcasted_iota(jnp.int32, pair.shape, 1)
    valid = (row < rows_total) & ((lane & 1) == 0)
    acc_ref[...] += jnp.sqrt(jnp.where(valid, pair, 0.0))

    @pl.when(i == inner_steps - 1)
    def _finalize():
        # One deferred cross-sublane reduce per core; the 2x128 partials are
        # summed by the wrapper.
        out_ref[...] = jnp.sum(acc_ref[...], axis=0, keepdims=True)


def nme_loss(outputs, labels):
    """sum over landmark points of sqrt(dx^2 + dy^2); returns a f32 scalar."""
    o = jnp.ravel(outputs)
    l = jnp.ravel(labels)
    if o.shape != l.shape:
        raise ValueError("outputs/labels shape mismatch")
    total = o.shape[0]
    if total % (2 * 68) != 0:
        raise ValueError("inputs must flatten to a multiple of 136 scalars")

    rem = total % _LANES
    if rem:
        # batch % 16 != 0: one pad copy is needed for the exact (R,128) view.
        pad = _LANES - rem
        o = jnp.pad(o, (0, pad))
        l = jnp.pad(l, (0, pad))
    rows = o.shape[0] // _LANES
    o2 = o.reshape(rows, _LANES)
    l2 = l.reshape(rows, _LANES)

    tile_rows = _TILE_ROWS if rows >= _TILE_ROWS else rows
    row_blocks = pl.cdiv(rows, tile_rows)
    inner_steps = pl.cdiv(row_blocks, 2)           # 2-way TensorCore split
    shift_next = _roll_next_shift()

    def in_index(c, i):
        # Clamp so the DMA window never starts past the array; the kernel's
        # unclamped row mask zeroes any duplicated / out-of-range rows.
        return (jnp.minimum(c * inner_steps + i, row_blocks - 1), 0)

    kernel = functools.partial(
        _nme_kernel, rows_total=rows, tile_rows=tile_rows,
        inner_steps=inner_steps, shift_next=shift_next)

    bytes_accessed = 2 * total * o2.dtype.itemsize + 2 * _LANES * 4
    partials = pl.pallas_call(
        kernel,
        out_shape=jax.ShapeDtypeStruct((2, _LANES), jnp.float32),
        grid=(2, inner_steps),
        in_specs=[pl.BlockSpec((tile_rows, _LANES), in_index),
                  pl.BlockSpec((tile_rows, _LANES), in_index)],
        out_specs=pl.BlockSpec((1, _LANES), lambda c, i: (c, 0)),
        scratch_shapes=[pltpu.VMEM((tile_rows, _LANES), jnp.float32)],
        compiler_params=pltpu.CompilerParams(
            dimension_semantics=("parallel", "arbitrary")),
        cost_estimate=pl.CostEstimate(
            flops=5 * total, transcendentals=total // 2,
            bytes_accessed=bytes_accessed),
    )(o2, l2)
    return jnp.sum(partials)


def _nme_loss_ref(outputs, labels):
    o = outputs.reshape(-1, 68, 2).astype(jnp.float32)
    l = labels.reshape(-1, 68, 2).astype(jnp.float32)
    return jnp.sum(jnp.sqrt(jnp.sum((o - l) ** 2, axis=2)))


if __name__ == "__main__":
    key = jax.random.PRNGKey(0)
    # batch=4 exercises the ragged (padded) path, batch=32 the zero-copy path.
    for batch in (4, 32):
        ko, kl = jax.random.split(jax.random.fold_in(key, batch))
        outputs = jax.random.normal(ko, (batch, 136), dtype=jnp.float32)
        labels = jax.random.normal(kl, (batch, 136), dtype=jnp.float32)

        loss = jax.block_until_ready(nme_loss(outputs, labels))
        ref = jax.block_until_ready(_nme_loss_ref(outputs, labels))
        assert jnp.allclose(loss, ref, rtol=1e-4, atol=1e-2), (batch, loss, ref)
    print("KERNEL_OK")
</pallas_src>

<mosaic_0001>
module attributes {stable_mosaic.version = 11 : i64} {
  func.func @_roll_probe_kernel(%arg0: memref<8x128xf32, #tpu.memory_space<vmem>>, %arg1: memref<8x128xf32, #tpu.memory_space<vmem>>) attributes {dimension_semantics = [], scalar_prefetch = 0 : i64, scratch_operands = 0 : i64, tpu.core_type = #tpu.core_type<tc>} {
    %c0 = arith.constant 0 : index
    %c0_0 = arith.constant 0 : index
    %0 = vector.load %arg0[%c0, %c0_0] : memref<8x128xf32, #tpu.memory_space<vmem>>, vector<8x128xf32>
    %c1_i32 = arith.constant 1 : i32
    %1 = tpu.dynamic_rotate %0 by %c1_i32 dim 1 : vector<8x128xf32>, i32 -> vector<8x128xf32>
    %c0_1 = arith.constant 0 : index
    %c0_2 = arith.constant 0 : index
    %2 = vector.load %arg1[%c0_1, %c0_2] : memref<8x128xf32, #tpu.memory_space<vmem>>, vector<8x128xf32>
    tpu.vector_store %arg1[%c0_1, %c0_2], %1 {strides = array<i32>} : memref<8x128xf32, #tpu.memory_space<vmem>>, vector<8x128xf32>,
    return
  }
}

</mosaic_0001>

<bundles_post_ra>
// kernel: tpu_custom_call.1
= control target key start
LH: loop header
LB: loop body
LE: loop exit
PB: predicated region body
PF: predicated region fallthrough
CT: control target
= control target key end

     0   :  { %6 = vsyncpa [#allocation3], 0  ;;  %s106_s0 = inlined_call_operand.hbm [shape: f32[8,128], index: 0, kind: input, shape index: {}]   ;;  %s107_s1 = inlined_call_operand.hbm [shape: f32[8,128], index: 1, kind: output, shape index: {}]  }
   0x1   :  { %7 = vsyncpa [#allocation4], 0  ;;  %s87_s6 = smov [#allocation2]  }
   0x2   :  { %s14_s7 = sshll.u32 %s87_s6, 4  ;;  %s15_s7 = int_to_ptr.vmem [resolvable:$true] %s14_s7 }
   0x3   :  { %s51_s8 = scalar_lea.vmem %s15_s7, 128  ;;  %p56_p1 = scmp.lt.s32.totalorder %s15_s7, %s15_s7 }
   0x4   :  { %p52_p0 = scmp.ne.s32.totalorder %s15_s7, %s51_s8  ;;  %p57_p2 = scmp.lt.s32.totalorder %s51_s8, %s51_s8 }
   0x6   :  { %p58_p3 = por %p57_p2, %p56_p1 }
   0x8   :  { %p59_p4 = pnand %p58_p3, %p52_p0 }
   0xa   :  { %62 = shalt.err (!%p59_p4)
}
   0xb   :  { %17 = dma.hbm_to_vmem [thread:$0]  %s106_s0, 128, %s15_s7, [#allocation3]  }
   0xc   :  { %83 = dma.done.wait [#allocation3], 128  }
   0xd   :  { %84 = vsyncadd [#allocation3], 4294967168  ;;  %v21_v0 = vld [vmem:[#allocation2] sm:$0xff]  ;;  %s88_s11 = smov 1   ;;  %s89_s12 = smov [#allocation5]  }
   0xe   :  { %22 = vrot.lane.b32.xlu0 %v21_v0, %s88_s11  ;;  %s31_s13 = sshll.u32 %s89_s12, 4  ;;  %s32_s13 = int_to_ptr.vmem [resolvable:$true] %s31_s13 }
   0xf   :  { %s63_s14 = scalar_lea.vmem %s32_s13, 128  ;;  %p68_p6 = scmp.lt.s32.totalorder %s32_s13, %s32_s13 }
  0x10   :  { %p64_p5 = scmp.ne.s32.totalorder %s32_s13, %s63_s14  ;;  %p69_p7 = scmp.lt.s32.totalorder %s63_s14, %s63_s14 }
  0x12   :  { %p70_p8 = por %p69_p7, %p68_p6 }
  0x14   :  { %p71_p9 = pnand %p70_p8, %p64_p5 }
  0x80   :  { %v23_v1 = vpop.permute.xlu0 %22 }
  0x81   :  { %24 = vst [vmem:[#allocation5] sm:$0xff] %v23_v1 }
  0x82   :  { %74 = shalt.err (!%p71_p9)
}
  0x83   :  { %34 = dma.vmem_to_hbm [thread:$0]  %s32_s13, 128, %s107_s1, [#allocation4]  }
  0x84   :  { %85 = dma.done.wait [#allocation4], 128  }
  0x85   :  { %86 = vsyncadd [#allocation4], 4294967168 }
  0x86   :  { %38 = vsyncpa [#allocation3], 1 }
  0x87   :  { %39 = vsyncpa [#allocation4], 1 }

</bundles_post_ra>
